<compile_context>
chip_gen: v7x
topology: tpu7x:2x2x1
jax: 0.10.0
libtpu: 0.0.40
codegen_flags: <defaults>
</compile_context>

<pallas_src>
import math
import numpy as np
import jax
import jax.numpy as jnp
from jax.experimental import pallas as pl
from jax.experimental.pallas import tpu as pltpu


def _round_up(v, m):
    return (v + m - 1) // m * m


# ----------------------------- Pallas kernel ------------------------------ #
def graph_conv_pallas(x, mul_L, u_t, W, bias):
    """x:(B,M,N)  mul_L:(Kp,N,N)  u_t:(N,N)  W:(Kp,N,out_c)  bias:(1,1,out_c)."""
    B, M, N = x.shape
    Kp, _, out_c = W.shape

    # Grid-invariant spectral combine (tiny; done once in XLA outside the
    # kernel), with the contraction order forced to avoid O(K*N^3):
    #   uw_k = u^T @ W_k              (N, out_c)
    #   Wc   = sum_k T_k(L~) @ uw_k   (N, out_c)
    uw = jnp.einsum('ij,kjo->kio', u_t.astype(jnp.float32), W.astype(jnp.float32))
    Wc = jnp.einsum('kij,kjo->io', mul_L.astype(jnp.float32), uw)

    # Lane-dense output: pad out_c to a multiple of 128.  Only the tiny
    # grid-invariant operands (Wc, bias) are padded in XLA; x is NOT copied.
    Op = _round_up(out_c, 128)
    Wc_p = (jnp.zeros((N, Op), jnp.float32).at[:, :out_c].set(Wc)
            .astype(jnp.bfloat16))                               # bf16 into MXU
    b_p = jnp.zeros((1, Op), jnp.float32).at[:, :out_c].set(
        bias.reshape(1, out_c).astype(jnp.float32))              # bias stays f32

    # x: plain bf16 cast only (halves HBM bytes); no padded materialization —
    # full-dim blocks below are exempt from the (8,128) divisibility rule.
    x_bf16 = x.astype(jnp.bfloat16)

    def kernel(x_ref, wc_ref, b_ref, o_ref):
        # x_ref:(M,N) bf16   wc_ref:(N,Op) bf16   b_ref:(1,Op) f32   o_ref:(M,Op) f32
        acc = jnp.dot(x_ref[...], wc_ref[...],
                      preferred_element_type=jnp.float32)        # MXU, f32 accumulate
        acc = acc + b_ref[...]                                   # (M, Op), f32
        # Exclude padded output lanes from the per-sample min/max.
        col_ok = jax.lax.broadcasted_iota(jnp.int32, acc.shape, 1) < out_c
        mn = jnp.min(jnp.where(col_ok, acc, jnp.inf), keepdims=True)    # (1, 1)
        mx = jnp.max(jnp.where(col_ok, acc, -jnp.inf), keepdims=True)   # (1, 1)
        rng = mx - mn
        safe = jnp.where(rng > 0.0, rng, 1.0)                    # no 0/0 NaN
        inv = pl.reciprocal(safe, approx=False)                  # one recip, not a tile divide
        scaled = (acc - mn) * (2.0 * inv) - 1.0
        o_ref[...] = jnp.where(rng > 0.0, scaled, acc)

    out_pad = pl.pallas_call(
        kernel,
        out_shape=jax.ShapeDtypeStruct((B, M, Op), jnp.float32),
        grid_spec=pltpu.PrefetchScalarGridSpec(
            num_scalar_prefetch=0,
            grid=(B,),                                           # one sample / step
            in_specs=[
                pl.BlockSpec((None, M, N), lambda b: (b, 0, 0)),  # x: streamed per step
                pl.BlockSpec((N, Op), lambda b: (0, 0)),          # Wc: VMEM-resident
                pl.BlockSpec((1, Op), lambda b: (0, 0)),          # bias: VMEM-resident
            ],
            out_specs=pl.BlockSpec((None, M, Op), lambda b: (b, 0, 0)),
        ),
        compiler_params=pltpu.CompilerParams(
            dimension_semantics=("parallel",),   # independent samples -> megacore on v7x
            vmem_limit_bytes=32 * 1024 * 1024,
        ),
    )(x_bf16, Wc_p, b_p)

    # Strip padded output lanes.
    return out_pad[:, :, :out_c]


# ------------------------------ glue / setup ------------------------------ #
def orthogonal_init(key, shape, gain):
    """Deterministic orthogonal init (same spirit as nn.init.orthogonal_)."""
    rows = shape[0]
    cols = int(np.prod(shape[1:]))
    a = np.asarray(jax.random.normal(key, (rows, cols), dtype=jnp.float32),
                   dtype=np.float64)
    transpose = rows < cols
    if transpose:
        a = a.T
    q, r = np.linalg.qr(a)
    q = q * np.sign(np.diag(r))
    if transpose:
        q = q.T
    return jnp.asarray(gain * q, dtype=jnp.float32).reshape(shape)


def get_laplacian(graph, normalize=True):
    if normalize:
        deg = jnp.sum(graph, axis=-1)
        D = jnp.diag(deg ** (-0.5))
        return jnp.eye(graph.shape[0], dtype=graph.dtype) - D @ graph @ D
    else:
        return jnp.diag(jnp.sum(graph, axis=-1)) - graph


def build_spectral_operands(graph, Kp):
    """Host-side spectral preprocessing (matches the torch/numpy reference)."""
    L = get_laplacian(graph, normalize=True)
    L_np = np.asarray(L, dtype=np.float32)
    # TODO(synk): general eigendecomposition has no Pallas/TPU equivalent; done
    # with numpy on host, exactly as the PyTorch reference (np.linalg.eig).
    # (eigh would be the numerically better choice for the symmetric Laplacian,
    #  but eig is kept to mirror the original module's semantics.)
    lam_c, u_c = np.linalg.eig(L_np)
    lam = lam_c.real.astype(np.float32).copy()
    q1 = np.percentile(lam, 50)
    lam[lam < q1] = 0.0
    lam_mat = np.diag(lam).astype(np.float32)
    u = u_c.real.astype(np.float32)
    N = lam_mat.shape[0]
    den = float(lam_mat.max() - lam_mat.min())
    if den == 0.0:                       # guard degenerate spectrum (host-side)
        den = 1.0
    lam_scaled = (2.0 * (lam_mat - lam_mat.min()) / den
                  - np.eye(N, dtype=np.float32)).astype(np.float32)
    # Chebyshev polynomial basis T_k(lam_scaled), k = 0..Kp-1
    mul_L = np.zeros((Kp, N, N), dtype=np.float32)
    mul_L[0] = np.eye(N, dtype=np.float32)
    if Kp > 1:
        mul_L[1] = lam_scaled
        for k in range(2, Kp):
            mul_L[k] = 2.0 * lam_scaled @ mul_L[k - 1] - mul_L[k - 2]
    return jnp.asarray(mul_L), jnp.asarray(u.T)


def reference_forward(x, mul_L, u_t, W, bias):
    """Pure-JAX f32 reference mirroring the torch code (mode=1)."""
    r = jnp.einsum('bmn,knp->kbmp', x, mul_L)          # inputs @ mul_L
    r = jnp.einsum('kbmn,np->kbmp', r, u_t)            # ... @ u.T
    r = jnp.einsum('kbmn,kno->kbmo', r, W)             # ... @ weight
    r = jnp.sum(r, axis=0) + bias.reshape(1, 1, -1)    # sum over K + bias
    outs = []
    for i in range(r.shape[0]):
        mn = jnp.min(r[i])
        mx = jnp.max(r[i])
        outs.append(jnp.where(mn == mx, r[i],
                              2.0 * (r[i] - mn) / (mx - mn) - 1.0))
    return jnp.stack(outs)


if __name__ == "__main__":
    # Small shapes: N (= in_c) graph nodes, M rows per sample, B samples.
    B, M, N, out_c, K = 2, 8, 16, 8, 2
    Kp = K + 1
    in_c = N  # mode-1 chaining requires inputs' last dim == in_c

    key = jax.random.PRNGKey(0)
    k_x, k_g, k_w, k_b = jax.random.split(key, 4)

    # deterministic inputs and symmetric positive graph
    x = jax.random.normal(k_x, (B, M, N), dtype=jnp.float32)
    adj = jax.random.uniform(k_g, (N, N), dtype=jnp.float32, minval=0.1, maxval=1.0)
    graph = 0.5 * (adj + adj.T)

    # parameters: weight (K+1, 1, in_c, out_c), bias (1, 1, out_c), orthogonal init
    gain = math.sqrt(2.0 / (1.0 + 0.4 ** 2))  # calculate_gain('leaky_relu', 0.4)
    weight = orthogonal_init(k_w, (Kp, 1, in_c, out_c), gain)
    bias = orthogonal_init(k_b, (1, 1, out_c), gain)

    # spectral preprocessing (host, matches reference's numpy path)
    mul_L, u_t = build_spectral_operands(graph, Kp)

    W = weight.reshape(Kp, in_c, out_c)

    out = graph_conv_pallas(x, mul_L, u_t, W, bias)
    out = jax.block_until_ready(out)

    ref = jax.block_until_ready(reference_forward(x, mul_L, u_t, W, bias))
    # Tolerance reflects the bf16 quantization of x / Wc at the kernel boundary
    # (accumulation and rescale stay f32); structural errors would be O(0.1-1),
    # so 3e-2 remains a meaningful end-to-end check against the f32 reference.
    np.testing.assert_allclose(np.asarray(out), np.asarray(ref),
                               rtol=3e-2, atol=3e-2)
    print("KERNEL_OK")
</pallas_src>

<mosaic_0001>
module attributes {stable_mosaic.version = 11 : i64} {
  func.func @kernel(%arg0: i32, %arg1: memref<1x8x16xbf16, #tpu.memory_space<vmem>>, %arg2: memref<16x128xbf16, #tpu.memory_space<vmem>>, %arg3: memref<1x128xf32, #tpu.memory_space<vmem>>, %arg4: memref<1x8x128xf32, #tpu.memory_space<vmem>>) attributes {dimension_semantics = [#tpu.dimension_semantics<parallel>], iteration_bounds = array<i64: 2>, scalar_prefetch = 0 : i64, scratch_operands = 0 : i64, tpu.core_type = #tpu.core_type<tc>, window_params = [{transform_indices = @transform_0, window_bounds = array<i64: 1, 8, 16>}, {pipeline_mode = #tpu.pipeline_mode<synchronous>, transform_indices = @transform_1, window_bounds = array<i64: 16, 128>}, {pipeline_mode = #tpu.pipeline_mode<synchronous>, transform_indices = @transform_2, window_bounds = array<i64: 1, 128>}, {transform_indices = @transform_3, window_bounds = array<i64: 1, 8, 128>}]} {
    %c0 = arith.constant 0 : index
    %c0_0 = arith.constant 0 : index
    %c0_1 = arith.constant 0 : index
    %0 = vector.load %arg1[%c0, %c0_0, %c0_1] : memref<1x8x16xbf16, #tpu.memory_space<vmem>>, vector<1x8x16xbf16>
    %1 = vector.shape_cast %0 : vector<1x8x16xbf16> to vector<8x16xbf16>
    %c0_2 = arith.constant 0 : index
    %c0_3 = arith.constant 0 : index
    %2 = vector.load %arg2[%c0_2, %c0_3] : memref<16x128xbf16, #tpu.memory_space<vmem>>, vector<16x128xbf16>
    %cst = arith.constant dense<0.000000e+00> : vector<8x128xf32>
    %3 = tpu.matmul %1, %2, %cst {dimension_numbers = #tpu.dot_dimension_numbers<[1], [0], [0], [1], [0, 0, 1, 1], [], []>} : vector<8x16xbf16>, vector<16x128xbf16>, vector<8x128xf32> -> vector<8x128xf32>
    %c0_4 = arith.constant 0 : index
    %c0_5 = arith.constant 0 : index
    %4 = vector.load %arg3[%c0_4, %c0_5] : memref<1x128xf32, #tpu.memory_space<vmem>>, vector<1x128xf32>
    %5 = vector.broadcast %4 : vector<1x128xf32> to vector<8x128xf32>
    %6 = arith.addf %3, %5 : vector<8x128xf32>
    %7 = tpu.iota {dimensions = array<i32: 1>} : vector<8x128xi32>
    %c8_i32 = arith.constant 8 : i32
    %8 = vector.broadcast %c8_i32 : i32 to vector<8x128xi32>
    %9 = arith.cmpi slt, %7, %8 : vector<8x128xi32>
    %cst_6 = arith.constant 0x7F800000 : f32
    %10 = vector.broadcast %cst_6 : f32 to vector<8x128xf32>
    %11 = arith.select %9, %6, %10 : vector<8x128xi1>, vector<8x128xf32>
    %12 = vector.shape_cast %11 : vector<8x128xf32> to vector<1x8x128xf32>
    %cst_7 = arith.constant dense<0x7F800000> : vector<1xf32>
    %13 = vector.multi_reduction <minimumf>, %12, %cst_7 [1, 2] : vector<1x8x128xf32> to vector<1xf32>
    %14 = vector.shape_cast %13 : vector<1xf32> to vector<1x1x1xf32>
    %15 = vector.extract %14[0, 0, 0] : f32 from vector<1x1x1xf32>
    %16 = vector.broadcast %15 : f32 to vector<1x1xf32>
    %cst_8 = arith.constant 0xFF800000 : f32
    %17 = vector.broadcast %cst_8 : f32 to vector<8x128xf32>
    %18 = arith.select %9, %6, %17 : vector<8x128xi1>, vector<8x128xf32>
    %19 = vector.shape_cast %18 : vector<8x128xf32> to vector<1x8x128xf32>
    %cst_9 = arith.constant dense<0xFF800000> : vector<1xf32>
    %20 = vector.multi_reduction <maximumf>, %19, %cst_9 [1, 2] : vector<1x8x128xf32> to vector<1xf32>
    %21 = vector.shape_cast %20 : vector<1xf32> to vector<1x1x1xf32>
    %22 = vector.extract %21[0, 0, 0] : f32 from vector<1x1x1xf32>
    %23 = vector.broadcast %22 : f32 to vector<1x1xf32>
    %24 = arith.subf %23, %16 : vector<1x1xf32>
    %cst_10 = arith.constant 0.000000e+00 : f32
    %25 = vector.broadcast %cst_10 : f32 to vector<1x1xf32>
    %26 = arith.cmpf ogt, %24, %25 : vector<1x1xf32>
    %cst_11 = arith.constant 1.000000e+00 : f32
    %27 = vector.broadcast %cst_11 : f32 to vector<1x1xf32>
    %28 = arith.select %26, %24, %27 : vector<1x1xi1>, vector<1x1xf32>
    %29 = tpu.reciprocal %28 : vector<1x1xf32> -> vector<1x1xf32>
    %30 = vector.broadcast %16 : vector<1x1xf32> to vector<8x128xf32>
    %31 = arith.subf %6, %30 : vector<8x128xf32>
    %cst_12 = arith.constant 2.000000e+00 : f32
    %32 = vector.broadcast %cst_12 : f32 to vector<1x1xf32>
    %33 = arith.mulf %32, %29 : vector<1x1xf32>
    %34 = vector.broadcast %33 : vector<1x1xf32> to vector<8x128xf32>
    %35 = arith.mulf %31, %34 : vector<8x128xf32>
    %cst_13 = arith.constant 1.000000e+00 : f32
    %36 = vector.broadcast %cst_13 : f32 to vector<8x128xf32>
    %37 = arith.subf %35, %36 : vector<8x128xf32>
    %cst_14 = arith.constant 0.000000e+00 : f32
    %38 = vector.broadcast %cst_14 : f32 to vector<1x1xf32>
    %39 = arith.cmpf ogt, %24, %38 : vector<1x1xf32>
    %40 = vector.shape_cast %39 : vector<1x1xi1> to vector<1x1xi1>
    %41 = vector.broadcast %40 : vector<1x1xi1> to vector<8x128xi1>
    %42 = arith.select %41, %37, %6 : vector<8x128xi1>, vector<8x128xf32>
    %c0_15 = arith.constant 0 : index
    %c0_16 = arith.constant 0 : index
    %c0_17 = arith.constant 0 : index
    %43 = vector.load %arg4[%c0_15, %c0_16, %c0_17] : memref<1x8x128xf32, #tpu.memory_space<vmem>>, vector<1x8x128xf32>
    %44 = vector.shape_cast %43 : vector<1x8x128xf32> to vector<8x128xf32>
    %45 = vector.shape_cast %42 : vector<8x128xf32> to vector<1x8x128xf32>
    tpu.vector_store %arg4[%c0_15, %c0_16, %c0_17], %45 {strides = array<i32>} : memref<1x8x128xf32, #tpu.memory_space<vmem>>, vector<1x8x128xf32>,
    return
  }
  func.func @transform_0(%arg0: i32) -> (i32, i32, i32) {
    %c0_i32 = arith.constant 0 : i32
    %c0_i32_0 = arith.constant 0 : i32
    %c0_i32_1 = arith.constant 0 : i32
    return %arg0, %c0_i32, %c0_i32_0 : i32, i32, i32
  }
  func.func @transform_1(%arg0: i32) -> (i32, i32) {
    %c0_i32 = arith.constant 0 : i32
    %c0_i32_0 = arith.constant 0 : i32
    %c0_i32_1 = arith.constant 0 : i32
    return %c0_i32, %c0_i32_0 : i32, i32
  }
  func.func @transform_2(%arg0: i32) -> (i32, i32) {
    %c0_i32 = arith.constant 0 : i32
    %c0_i32_0 = arith.constant 0 : i32
    %c0_i32_1 = arith.constant 0 : i32
    return %c0_i32, %c0_i32_0 : i32, i32
  }
  func.func @transform_3(%arg0: i32) -> (i32, i32, i32) {
    %c0_i32 = arith.constant 0 : i32
    %c0_i32_0 = arith.constant 0 : i32
    %c0_i32_1 = arith.constant 0 : i32
    return %arg0, %c0_i32, %c0_i32_0 : i32, i32, i32
  }
}

</mosaic_0001>

<bundles_post_ra>
// kernel: tpu_custom_call.1
= control target key start
LH: loop header
LB: loop body
LE: loop exit
PB: predicated region body
PF: predicated region fallthrough
CT: control target
= control target key end

     0   :  { %8 = vsyncpa [#allocation3], 0  ;;  %s844_s0 = inlined_call_operand.hbm [shape: bf16[2,8,16], index: 0, kind: input, shape index: {}]   ;;  %s845_s1 = inlined_call_operand.hbm [shape: bf16[16,128], index: 1, kind: input, shape index: {}]   ;;  %s846_s2 = inlined_call_operand.vmem [shape: f32[1,128], index: 2, kind: input, shape index: {}]   ;;  %s847_s3 = inlined_call_operand.hbm [shape: f32[2,8,128], index: 3, kind: output, shape index: {}]  }
   0x1   :  { %10 = vsyncpa [#allocation3 + $0x1], 0 }
   0x2   :  { %11 = vsyncpa [#allocation6], 0 }
   0x3   :  { %12 = vsyncpa [#allocation4], 0 }
   0x4   :  { %14 = vsyncpa [#allocation4 + $0x1], 0  ;;  %s644_s12 = smov 0   ;;  %s646_s13 = smov 0  }
   0x5   :  { %s648_s14 = smov 0   ;;  %s650_s15 = smov 0  }
   0x6 LB: > { %s665_s16 = sadd.s32 4294967295, %s615_s15   ;;  %s393_s17 = sadd.s32 4294967294, %s615_s15   ;;  %s615_s15 = sphi %s650_s15, %s867_s15   ;;  %s611_s14 = sphi %s648_s14, %s866_s14   ;;  %s607_s13 = sphi %s646_s13, %s865_s13   ;;  %s603_s12 = sphi %s644_s12, %s864_s12  }
   0x7   : > { %p40_p0 = scmp.ne.s32.totalorder %s607_s13, %s603_s12  ;;  %p848_p1 = scmp.eq.s32.totalorder %s665_s16, 0 }
   0x8   : > { %p112_p3 = scmp.eq.s32.totalorder %s393_s17, 1  ;;  %p394_p5 = scmp.ge.s32.totalorder %s615_s15, 1 }
   0x9   : > { %p674_p4 = por %p848_p1, %p40_p0  ;;  %p119_p7 = scmp.lt.s32.totalorder %s615_s15, 3 }
   0xa   : > { %p679_p6 = por %p112_p3, %p40_p0  ;;  %s617_s21 = smov [#allocation5]  }
   0xb   : > { %s851_s18 = scalar_select %p674_p4, 1, 0 }
   0xc   : > { %s852_s19 = scalar_select %p679_p6, 1, 0 }
   0xd   : > { %p684_p8 = pnand %p394_p5, %p119_p7  ;;  %s131_s22 = sshll.u32 %s617_s21, 4  ;;  %s688_s22 = int_to_ptr.vmem [resolvable:$true] %s131_s22 }
   0xe   : > { %s700_s24 = sadd.s32 1, %s615_s15   ;;  %s27_s25 = sadd.s32 1, %s611_s14 }
   0xf   : > { %s853_s20 = scalar_select %p684_p8, 1, 0 }
  0x10   : > { %p431_p9 = pneg %p684_p8  ;;  %s24_s26 = ssub.s32 %s615_s15, %s700_s24 }
  0x11   : > { %s487_s29 = scalar_lea.hbm %s845_s1, 128 }
  0x12   : > { %p695_p11 = pnand %p431_p9, %p848_p1  ;;  %p488_p12 = scmp.ne.s32.totalorder %s845_s1, %s487_s29 }
  0x13   : > { %p494_p5 = scmp.lt.u32.totalorder %s487_s29, %s845_s1 }
  0x14   : > { %p489_p13 = pneg %p695_p11 }
  0x16   : > { %p490_p0 = pnand %p489_p13, %p488_p12 }
  0x18   : > { %p491_p3 = pneg %p490_p0 }
  0x1a   : > { %p496_p7 = pnand %p494_p5, %p491_p3 }
  0x1c   : > { %499 = shalt.err (!%p496_p7)
}
  0x1d   : > { %s500_s7 = scalar_lea.vmem %s688_s22, 128  ;;  %p508_p2 = scmp.lt.s32.totalorder %s688_s22, %s688_s22 }
  0x1e   : > { %p501_p9 = scmp.ne.s32.totalorder %s688_s22, %s500_s7  ;;  %p509_p6 = scmp.lt.s32.totalorder %s500_s7, %s500_s7 }
  0x20   : > { %p503_p10 = pnand %p501_p9, %p489_p13  ;;  %p510_p4 = por %p509_p6, %p508_p2 }
  0x22   : > { %p504_p1 = pneg %p503_p10 }
  0x24   : > { %p511_p8 = pnand %p510_p4, %p504_p1 }
  0x26   : > { %514 = shalt.err (!%p511_p8)
}
  0x27   : > { %s618_s8 = smov 64   ;;  %s619_s9 = smov 4  }
  0x28   : > { %434 = dma.hbm_to_vmem [thread:$0]  (!%p695_p11), %s845_s1, 128, %s688_s22, [#allocation6], %s618_s8, %s618_s8, %s619_s9  }
  0x29   : > { %p25_p2 = scmp.eq.s32.totalorder %s24_s26, 0  ;;  %p34_p1 = scmp.ne.s32.totalorder %s611_s14, %s607_s13 }
  0x2a   : > { %p35_p4 = scmp.eq.s32.totalorder %s615_s15, 0  ;;  %p444_p6 = scmp.lt.s32.totalorder %s615_s15, 2 }
  0x2b   : > { %s731_s17 = scalar_select %p25_p2, %s611_s14, %s27_s25  }
  0x2c   : > { %p36_p8 = por %p35_p4, %p34_p1  ;;  %p855_p10 = scmp.eq.s32.totalorder %s665_s16, 1 }
  0x2d   : > { %s148_s27 = sand.u32 1, %s611_s14   ;;  %s398_s28 = sshll.u32 %s615_s15, 6 }
  0x2e   : > { %p735_p12 = por %p855_p10, %p34_p1  ;;  %s397_s29 = sshll.u32 %s148_s27, 2 }
  0x2f   : > { %s744_s4 = scalar_lea.hbm %s844_s0, %s398_s28  ;;  %s152_s22 = scalar_lea.vmem [#allocation2], %s397_s29 }
  0x30   : > { %s159_s25 = sshll.u32 %s152_s22, 4  ;;  %p746_p11 = pnand %p444_p6, %p36_p8  ;;  %s750_s25 = int_to_ptr.vmem [resolvable:$true] %s159_s25 }
  0x31   : > { %s149_s5 = scalar_lea.sflag [#allocation3], %s148_s27  ;;  %s515_s6 = scalar_lea.hbm %s744_s4, 64 }
  0x32   : > { %p516_p13 = scmp.ne.s32.totalorder %s744_s4, %s515_s6  ;;  %p517_p0 = pneg %p746_p11 }
  0x33   : > { %s520_s9 = scalar_lea.hbm %s844_s0, 128  ;;  %p521_p7 = scmp.lt.u32.totalorder %s744_s4, %s844_s0 }
  0x34   : > { %p518_p3 = pnand %p517_p0, %p516_p13  ;;  %p522_p9 = scmp.lt.u32.totalorder %s520_s9, %s515_s6 }
  0x35   : > { %p524_p1 = scmp.lt.u32.totalorder %s515_s6, %s744_s4 }
  0x36   : > { %p519_p5 = pneg %p518_p3  ;;  %p523_p2 = por %p522_p9, %p521_p7 }
  0x38   : > { %p525_p4 = por %p524_p1, %p523_p2 }
  0x3a   : > { %p526_p6 = pnand %p525_p4, %p519_p5 }
  0x3c   : > { %529 = shalt.err (!%p526_p6)
}
  0x3d   : > { %s530_s27 = scalar_lea.vmem %s750_s25, 64  ;;  %s620_s28 = smov [#allocation2]  }
  0x3e   : > { %p531_p8 = scmp.ne.s32.totalorder %s750_s25, %s530_s27  ;;  %s535_s29 = sshll.u32 %s620_s28, 4  ;;  %s536_s29 = int_to_ptr.vmem [resolvable:$false] %s535_s29 }
  0x3f   : > { %s537_s23 = scalar_lea.vmem %s536_s29, 128  ;;  %p538_p3 = scmp.lt.s32.totalorder %s750_s25, %s536_s29 }
  0x40   : > { %p533_p10 = pnand %p531_p8, %p517_p0  ;;  %p539_p7 = scmp.lt.s32.totalorder %s537_s23, %s530_s27 }
  0x42   : > { %p534_p13 = pneg %p533_p10  ;;  %p540_p9 = por %p539_p7, %p538_p3 }
  0x44   : > { %p541_p2 = pnand %p540_p9, %p534_p13 }
  0x46   : > { %544 = shalt.err (!%p541_p2)
}
  0x47   : > { %438 = dma.hbm_to_vmem [thread:$0]  (!%p746_p11), %s744_s4, 64, %s750_s25, %s149_s5  }
  0x48   : > { %p858_p5 = scmp.ne.s32.totalorder %s853_s20, 0 }
  0x49   : > { %s780_s30 = sand.u32 (!%p858_p5), 1, %s607_s13   ;;  %p859_p0 = scmp.ne.s32.totalorder (!%p858_p5), %s851_s18, 0 }
  0x4a   : > { %168 = sbr.rel (%p858_p5) target bundleno = 550 (0x226), region = 32  ;;  %s400_s22 = sshll.u32 (!%p858_p5), %s780_s30, 2 }
  0x4b   : > { %s171_s6 = scalar_lea.sflag (!%p858_p5), [#allocation3], %s780_s30  ;;  %s174_s7 = scalar_lea.vmem (!%p858_p5), [#allocation2], %s400_s22 }
  0x51   : > { %590 = dma.done.wait (%p859_p0), %s171_s6, 64  }
  0x52   : > { %592 = vsyncadd (%p859_p0), %s171_s6, 4294967232  ;;  %p860_p1 = scmp.eq.s32.totalorder %s665_s16, 0 }
  0x54   : > { %594 = dma.done.wait (%p860_p1), [#allocation6], 128   ;;  %p861_p11 = pmov %p860_p1 }
  0x55   : > { %v621_v0 = vmov 0.0   ;;  %vm622_vm0 = vmmov 0   ;;  %v484_v1 = vld [vmem:[#allocation5] sm:$0xff]   ;;  %v202_v2 = vld [vmem:[%s174_s7] sm:$0xf]  ;;  %vm218_vm1 = vcmask 130048   ;;  %v262_v3 = vlaneseq }
  0x56   : > { %596 = vsyncadd (%p861_p11), [#allocation6], 4294967168  ;;  %413 = vmatprep.subr.bf16.mxu0 %v621_v0  ;;  %415 = vmatprep.mubr.msk.bf16.mxu0 %vm622_vm0, %v621_v0  ;;  %v403_v5 = vld [vmem:[%s846_s2] ss:$0 sm:$0xff]  ;;  %s402_s26 = sshll.u32 %s780_s30, 3  ;;  %s408_s5 = sshll.u32 %s665_s16, 7 }
  0x57   : > { %414 = vmatpush3.bf16.msra.mxu0 %v484_v1  ;;  %v263_v4 = vand.u32 127, %v262_v3  ;;  %s200_s8 = scalar_lea.vmem [#allocation7], %s402_s26  ;;  %s800_s27 = scalar_lea.hbm %s847_s3, %s408_s5 }
  0x58   : > { %s313_s9 = sshll.u32 %s200_s8, 4  ;;  %s300_s28 = scalar_lea.sflag [#allocation4], %s780_s30  ;;  %s802_s9 = int_to_ptr.vmem [resolvable:$true] %s313_s9 }
  0x59   : > { %vm264_vm2 = vcmp.lt.s32.totalorder %v263_v4, 8  ;;  %s545_s29 = scalar_lea.vmem %s802_s9, 128  ;;  %s623_s16 = smov [#allocation7]  }
  0x5a   : > { %416 = vmatmul.mubr.msk.bf16.vlgmr.msra.gmra.mrb[0].mxu0 %vm218_vm1, %v202_v2  ;;  %p546_p4 = scmp.ne.s32.totalorder %s802_s9, %s545_s29  ;;  %s549_s23 = sshll.u32 %s623_s16, 4  ;;  %s550_s23 = int_to_ptr.vmem [resolvable:$false] %s549_s23 }
  0x5b   : > { %s551_s22 = scalar_lea.vmem %s550_s23, 256  ;;  %p552_p10 = scmp.lt.s32.totalorder %s802_s9, %s550_s23 }
  0x5c   : > { %p547_p6 = pnand %p546_p4, %p735_p12  ;;  %p553_p13 = scmp.lt.s32.totalorder %s551_s22, %s545_s29 }
  0x5e   : > { %p548_p8 = pneg %p547_p6  ;;  %p554_p3 = por %p553_p13, %p552_p10 }
  0x60   : > { %p555_p7 = pnand %p554_p3, %p548_p8 }
 0x12d   : > { %v256_v6 = vpop.f32.mrb[0].mxu0 }
 0x12e   : > { %v257_v7 = vadd.f32 %v403_v5, %v256_v6  ;;  %v417_v8 = vpop.f32.mrb[1].mxu0 }
 0x12f   : > { %v259_v9 = vpop.f32.mrb[2].mxu0 }
 0x130   : > { %v418_v10 = vpop.f32.mrb[3].mxu0  ;;  %v265_v11 = vsel %vm264_vm2, %v257_v7, inf  ;;  %v276_v12 = vsel %vm264_vm2, %v257_v7, -inf }
 0x131   : > { %266 = vmin.xlane.f32.xlu0 %v265_v11 }
 0x135   : > { %277 = vmax.xlane.f32.xlu0 %v276_v12 }
 0x1be   : > { %v267_v13 = vpop.xlane.xlu0 %266 }
 0x1bf   : > { %v268_v14 = vrot.slane %v267_v13, 4 }
 0x1c1   : > { %v269_v15 = vmin.f32 %v267_v13, %v268_v14 }
 0x1c2   : > { %v278_v16 = vpop.xlane.xlu0 %277 }
 0x1c3   : > { %v270_v17 = vrot.slane %v269_v15, 2  ;;  %v279_v18 = vrot.slane %v278_v16, 4 }
 0x1c5   : > { %v280_v19 = vmax.f32 %v278_v16, %v279_v18  ;;  %v271_v20 = vmin.f32 %v269_v15, %v270_v17 }
 0x1c7   : > { %v281_v21 = vrot.slane %v280_v19, 2  ;;  %v272_v22 = vrot.slane %v271_v20, 1 }
 0x1c9   : > { %v282_v23 = vmax.f32 %v280_v19, %v281_v21  ;;  %v273_v24 = vmin.f32 %v271_v20, %v272_v22 }
 0x1cb   : > { %419 = vpush %v273_v24  ;;  %v283_v25 = vrot.slane %v282_v23, 1 }
 0x1cd   : > { %v284_v26 = vmax.f32 %v282_v23, %v283_v25 }
 0x1cf   : > { %421 = vpush %v284_v26 }
 0x1fc   : > { %s420_s4 = spop %419 }
 0x1fd   : > { %v275_v27 = vstv %s420_s4 }
 0x1fe   : > { %v291_v32 = vsub.f32 %v257_v7, %v275_v27 }
 0x200   : > { %s422_s25 = spop %421 }
 0x201   : > { %v286_v28 = vstv %s422_s25 }
 0x202   : > { %v287_v29 = vsub.f32 %v286_v28, %v275_v27 }
 0x204   : > { %vm288_vm3 = vcmp.gt.f32.partialorder %v287_v29, 0.0 }
 0x205   : > { %v289_v30 = vsel %vm288_vm3, %v287_v29, 1.0 }
 0x206   : > { %485 = vrcp.f32 %v289_v30 }
 0x210   : > { %v486_v31 = vpop.eup %485 }
 0x211   : > { %v292_v33 = vmul.f32 2.0, %v486_v31 }
 0x213   : > { %v293_v34 = vmul.f32 %v292_v33, %v291_v32 }
 0x215   : > { %v406_v35 = vadd.f32 -1.0, %v293_v34 }
 0x217   : > { %v297_v36 = vsel %vm288_vm3, %v406_v35, %v257_v7 }
 0x218   : > { %298 = vst [vmem:[%s200_s8] sm:$0xff] %v297_v36 }
 0x219   : > { %558 = shalt.err (!%p555_p7)
}
 0x21a   : > { %s559_s30 = scalar_lea.hbm %s800_s27, 128  ;;  %s563_s20 = scalar_lea.hbm %s847_s3, 256 }
 0x21b   : > { %p560_p9 = scmp.ne.s32.totalorder %s800_s27, %s559_s30  ;;  %p564_p0 = scmp.lt.u32.totalorder %s800_s27, %s847_s3 }
 0x21c   : > { %p565_p1 = scmp.lt.u32.totalorder %s563_s20, %s559_s30  ;;  %p567_p4 = scmp.lt.u32.totalorder %s559_s30, %s800_s27 }
 0x21d   : > { %p561_p2 = pnand %p560_p9, %p735_p12 }
 0x21e   : > { %p566_p11 = por %p565_p1, %p564_p0 }
 0x21f   : > { %p562_p5 = pneg %p561_p2 }
 0x220   : > { %p568_p6 = por %p567_p4, %p566_p11 }
 0x222   : > { %p569_p8 = pnand %p568_p6, %p562_p5 }
 0x224   : > { %572 = shalt.err (!%p569_p8)
}
 0x225   : > { %429 = dma.vmem_to_hbm [thread:$0]  (%p735_p12), %s802_s9, 128, %s800_s27, %s300_s28  }
 0x226 PF: > { %s325_s25 = sand.u32 1, %s603_s12   ;;  %p862_p10 = scmp.ne.s32.totalorder %s852_s19, 0 }
 0x227   : > { %p863_p13 = scmp.ge.s32.totalorder %s615_s15, 2  ;;  %s326_s26 = scalar_lea.sflag [#allocation4], %s325_s25 }
 0x229   : > { %p440_p3 = pnand %p863_p13, %p862_p10 }
 0x22b   : > { %598 = dma.done.wait (!%p440_p3), %s326_s26, 128  }
 0x22c   : > { %600 = vsyncadd (!%p440_p3), %s326_s26, 4294967168  ;;  %p17_p7 = scmp.ge.s32.totalorder %s700_s24, 4   ;;  %s864_s12 = smov %s607_s13 }
 0x22d   : > { %s865_s13 = smov %s611_s14  ;;  %s866_s14 = smov %s731_s17 }
 0x22e   : > { %s867_s15 = smov %s700_s24  ;;  %19 = sbr.rel (!%p17_p7) target bundleno = 6 (0x6), region = 81 }
 0x235   :  { %331 = vsyncpa [#allocation3], 1 }
 0x236   :  { %333 = vsyncpa [#allocation3 + $0x1], 1 }
 0x237   :  { %334 = vsyncpa [#allocation6], 1 }
 0x238   :  { %335 = vsyncpa [#allocation4], 1 }
 0x239   :  { %337 = vsyncpa [#allocation4 + $0x1], 1 }

</bundles_post_ra>
